<compile_context>
chip_gen: v5e
topology: v5e:2x2
jax: 0.10.0
libtpu: 0.0.40
codegen_flags: <defaults>
</compile_context>

<pallas_src>
import jax
import jax.numpy as jnp
from jax import lax
from jax.experimental import pallas as pl
from jax.experimental.pallas import tpu as pltpu


def _d_net_gauss_kernel(x_ref, w1t_ref, b1_ref, w2t_ref, b2_ref,
                        w3t_ref, b3_ref, oT_ref):
    x = x_ref[...]                                     # (tb, z_dim)

    # Layer 1: h^T = W1^T @ x^T + b1 -> (N, tb); contract minor dims of both
    # operands so no in-kernel transpose of x is needed.
    h = lax.dot_general(
        w1t_ref[...], x,
        dimension_numbers=(((1,), (1,)), ((), ())),
        preferred_element_type=jnp.float32) + b1_ref[...]
    h = jnp.maximum(h, 0.0)                            # ReLU (dropout = identity)

    # Layer 2: Linear(N -> N) + ReLU, batch stays on lanes.
    h = jnp.dot(w2t_ref[...], h,
                preferred_element_type=jnp.float32) + b2_ref[...]
    h = jnp.maximum(h, 0.0)

    # Layer 3: Linear(N -> 1) + sigmoid -> (1, tb) lane-dense output tile.
    y = jnp.dot(w3t_ref[...], h,
                preferred_element_type=jnp.float32) + b3_ref[...]
    oT_ref[...] = jax.nn.sigmoid(y).astype(oT_ref.dtype)


def d_net_gauss_forward(x, params, *, tb=512):
    """x: (B, z_dim) float32.  params: dict of (in,out) weights, (1,out) biases."""
    B, z_dim = x.shape
    N = params["w2"].shape[0]

    # Tiny parameter reshapes (negligible; x itself is untouched).
    w1t = params["w1"].T.astype(jnp.float32)           # (N, z_dim)
    b1 = params["b1"].reshape(N, 1).astype(jnp.float32)
    w2t = params["w2"].T.astype(jnp.float32)           # (N, N)
    b2 = params["b2"].reshape(N, 1).astype(jnp.float32)
    w3t = params["w3"].T.astype(jnp.float32)           # (1, N)
    b3 = params["b3"].reshape(1, 1).astype(jnp.float32)

    # Lane-tile selection: multiple of 128, clamped to the padded batch.
    tb = max(128, (tb // 128) * 128)
    tb = min(tb, pl.cdiv(B, 128) * 128)
    b_pad = pl.cdiv(B, tb) * tb

    x = x.astype(jnp.float32)
    if b_pad != B:                                     # pad batch rows only if needed
        x = jnp.pad(x, ((0, b_pad - B), (0, 0)))

    cost = pl.CostEstimate(
        flops=2 * b_pad * (z_dim * N + N * N + N),
        transcendentals=b_pad,                         # one sigmoid per row
        bytes_accessed=(b_pad * z_dim * 4
                        + (N * z_dim + N + N * N + N + N + 1) * 4
                        + b_pad * 4),
    )

    oT = pl.pallas_call(
        _d_net_gauss_kernel,
        out_shape=jax.ShapeDtypeStruct((1, b_pad), jnp.float32),
        grid=(b_pad // tb,),
        in_specs=[
            pl.BlockSpec((tb, z_dim), lambda i: (i, 0)),   # x batch tile
            pl.BlockSpec((N, z_dim), lambda i: (0, 0)),    # W1^T (resident)
            pl.BlockSpec((N, 1), lambda i: (0, 0)),        # b1
            pl.BlockSpec((N, N), lambda i: (0, 0)),        # W2^T
            pl.BlockSpec((N, 1), lambda i: (0, 0)),        # b2
            pl.BlockSpec((1, N), lambda i: (0, 0)),        # W3^T
            pl.BlockSpec((1, 1), lambda i: (0, 0)),        # b3
        ],
        out_specs=pl.BlockSpec((1, tb), lambda i: (0, i)), # lane-dense output
        compiler_params=pltpu.CompilerParams(
            dimension_semantics=("parallel",)),
        cost_estimate=cost,
    )(x, w1t, b1, w2t, b2, w3t, b3)

    return oT[:, :B].T                                  # back to (B, 1) like PyTorch


def init_params(key, z_dim, N):
    """Deterministic synthetic parameters, PyTorch-Linear-style uniform init."""
    ks = jax.random.split(key, 6)

    def lin(kw, kb, fan_in, fan_out):
        bound = 1.0 / jnp.sqrt(fan_in)
        w = jax.random.uniform(kw, (fan_in, fan_out), jnp.float32, -bound, bound)
        b = jax.random.uniform(kb, (1, fan_out), jnp.float32, -bound, bound)
        return w, b

    w1, b1 = lin(ks[0], ks[1], z_dim, N)
    w2, b2 = lin(ks[2], ks[3], N, N)
    w3, b3 = lin(ks[4], ks[5], N, 1)
    return {"w1": w1, "b1": b1, "w2": w2, "b2": b2, "w3": w3, "b3": b3}


def reference_forward(x, p):
    h = jnp.maximum(x @ p["w1"] + p["b1"], 0.0)
    h = jnp.maximum(h @ p["w2"] + p["b2"], 0.0)
    return jax.nn.sigmoid(h @ p["w3"] + p["b3"])


if __name__ == "__main__":
    B, z_dim, N = 512, 8, 32   # small shapes consistent with the module
    key = jax.random.PRNGKey(0)
    kx, kp = jax.random.split(key)
    x = jax.random.normal(kx, (B, z_dim), jnp.float32)
    params = init_params(kp, z_dim, N)

    out = d_net_gauss_forward(x, params)     # tb=512 -> single grid step here
    out = jax.block_until_ready(out)

    ref = reference_forward(x, params)
    assert out.shape == (B, 1)
    assert jnp.allclose(out, ref, atol=1e-5, rtol=1e-5), "mismatch vs reference"
    print("KERNEL_OK")
</pallas_src>

<mosaic_0001>
module attributes {stable_mosaic.version = 11 : i64} {
  func.func @_d_net_gauss_kernel(%arg0: i32, %arg1: memref<512x8xf32, #tpu.memory_space<vmem>>, %arg2: memref<32x8xf32, #tpu.memory_space<vmem>>, %arg3: memref<32x1xf32, #tpu.memory_space<vmem>>, %arg4: memref<32x32xf32, #tpu.memory_space<vmem>>, %arg5: memref<32x1xf32, #tpu.memory_space<vmem>>, %arg6: memref<1x32xf32, #tpu.memory_space<vmem>>, %arg7: memref<1x1xf32, #tpu.memory_space<vmem>>, %arg8: memref<1x512xf32, #tpu.memory_space<vmem>>) attributes {dimension_semantics = [#tpu.dimension_semantics<parallel>], iteration_bounds = array<i64: 1>, scalar_prefetch = 0 : i64, scratch_operands = 0 : i64, tpu.core_type = #tpu.core_type<tc>, window_params = [{transform_indices = @transform_0, window_bounds = array<i64: 512, 8>}, {pipeline_mode = #tpu.pipeline_mode<synchronous>, transform_indices = @transform_1, window_bounds = array<i64: 32, 8>}, {pipeline_mode = #tpu.pipeline_mode<synchronous>, transform_indices = @transform_2, window_bounds = array<i64: 32, 1>}, {pipeline_mode = #tpu.pipeline_mode<synchronous>, transform_indices = @transform_3, window_bounds = array<i64: 32, 32>}, {pipeline_mode = #tpu.pipeline_mode<synchronous>, transform_indices = @transform_4, window_bounds = array<i64: 32, 1>}, {pipeline_mode = #tpu.pipeline_mode<synchronous>, transform_indices = @transform_5, window_bounds = array<i64: 1, 32>}, {pipeline_mode = #tpu.pipeline_mode<synchronous>, transform_indices = @transform_6, window_bounds = array<i64: 1, 1>}, {transform_indices = @transform_7, window_bounds = array<i64: 1, 512>}]} {
    %c0 = arith.constant 0 : index
    %c0_0 = arith.constant 0 : index
    %0 = vector.load %arg1[%c0, %c0_0] : memref<512x8xf32, #tpu.memory_space<vmem>>, vector<512x8xf32>
    %c0_1 = arith.constant 0 : index
    %c0_2 = arith.constant 0 : index
    %1 = vector.load %arg2[%c0_1, %c0_2] : memref<32x8xf32, #tpu.memory_space<vmem>>, vector<32x8xf32>
    %cst = arith.constant dense<0.000000e+00> : vector<32x512xf32>
    %2 = tpu.matmul %1, %0, %cst {dimension_numbers = #tpu.dot_dimension_numbers<[1], [1], [0], [0], [0, 0, 1, 0], [], []>} : vector<32x8xf32>, vector<512x8xf32>, vector<32x512xf32> -> vector<32x512xf32>
    %c0_3 = arith.constant 0 : index
    %c0_4 = arith.constant 0 : index
    %3 = vector.load %arg3[%c0_3, %c0_4] : memref<32x1xf32, #tpu.memory_space<vmem>>, vector<32x1xf32>
    %4 = vector.broadcast %3 : vector<32x1xf32> to vector<32x512xf32>
    %5 = arith.addf %2, %4 : vector<32x512xf32>
    %cst_5 = arith.constant 0.000000e+00 : f32
    %6 = vector.broadcast %cst_5 : f32 to vector<32x512xf32>
    %7 = arith.maximumf %5, %6 : vector<32x512xf32>
    %c0_6 = arith.constant 0 : index
    %c0_7 = arith.constant 0 : index
    %8 = vector.load %arg4[%c0_6, %c0_7] : memref<32x32xf32, #tpu.memory_space<vmem>>, vector<32x32xf32>
    %cst_8 = arith.constant dense<0.000000e+00> : vector<32x512xf32>
    %9 = tpu.matmul %8, %7, %cst_8 {dimension_numbers = #tpu.dot_dimension_numbers<[1], [0], [0], [1], [0, 0, 1, 1], [], []>} : vector<32x32xf32>, vector<32x512xf32>, vector<32x512xf32> -> vector<32x512xf32>
    %c0_9 = arith.constant 0 : index
    %c0_10 = arith.constant 0 : index
    %10 = vector.load %arg5[%c0_9, %c0_10] : memref<32x1xf32, #tpu.memory_space<vmem>>, vector<32x1xf32>
    %11 = vector.broadcast %10 : vector<32x1xf32> to vector<32x512xf32>
    %12 = arith.addf %9, %11 : vector<32x512xf32>
    %cst_11 = arith.constant 0.000000e+00 : f32
    %13 = vector.broadcast %cst_11 : f32 to vector<32x512xf32>
    %14 = arith.maximumf %12, %13 : vector<32x512xf32>
    %c0_12 = arith.constant 0 : index
    %c0_13 = arith.constant 0 : index
    %15 = vector.load %arg6[%c0_12, %c0_13] : memref<1x32xf32, #tpu.memory_space<vmem>>, vector<1x32xf32>
    %cst_14 = arith.constant dense<0.000000e+00> : vector<1x512xf32>
    %16 = tpu.matmul %15, %14, %cst_14 {dimension_numbers = #tpu.dot_dimension_numbers<[1], [0], [0], [1], [0, 0, 1, 1], [], []>} : vector<1x32xf32>, vector<32x512xf32>, vector<1x512xf32> -> vector<1x512xf32>
    %c0_15 = arith.constant 0 : index
    %c0_16 = arith.constant 0 : index
    %17 = vector.load %arg7[%c0_15, %c0_16] : memref<1x1xf32, #tpu.memory_space<vmem>>, vector<1x1xf32>
    %18 = vector.broadcast %17 : vector<1x1xf32> to vector<1x512xf32>
    %19 = arith.addf %16, %18 : vector<1x512xf32>
    %20 = arith.negf %19 : vector<1x512xf32>
    %21 = math.exp %20 : vector<1x512xf32>
    %cst_17 = arith.constant 1.000000e+00 : f32
    %22 = vector.broadcast %cst_17 : f32 to vector<1x512xf32>
    %23 = arith.addf %22, %21 : vector<1x512xf32>
    %24 = arith.divf %22, %23 : vector<1x512xf32>
    %c0_18 = arith.constant 0 : index
    %c0_19 = arith.constant 0 : index
    %25 = vector.load %arg8[%c0_18, %c0_19] : memref<1x512xf32, #tpu.memory_space<vmem>>, vector<1x512xf32>
    tpu.vector_store %arg8[%c0_18, %c0_19], %24 {strides = array<i32>} : memref<1x512xf32, #tpu.memory_space<vmem>>, vector<1x512xf32>,
    return
  }
  func.func @transform_0(%arg0: i32) -> (i32, i32) {
    %c0_i32 = arith.constant 0 : i32
    %c0_i32_0 = arith.constant 0 : i32
    return %arg0, %c0_i32 : i32, i32
  }
  func.func @transform_1(%arg0: i32) -> (i32, i32) {
    %c0_i32 = arith.constant 0 : i32
    %c0_i32_0 = arith.constant 0 : i32
    %c0_i32_1 = arith.constant 0 : i32
    return %c0_i32, %c0_i32_0 : i32, i32
  }
  func.func @transform_2(%arg0: i32) -> (i32, i32) {
    %c0_i32 = arith.constant 0 : i32
    %c0_i32_0 = arith.constant 0 : i32
    %c0_i32_1 = arith.constant 0 : i32
    return %c0_i32, %c0_i32_0 : i32, i32
  }
  func.func @transform_3(%arg0: i32) -> (i32, i32) {
    %c0_i32 = arith.constant 0 : i32
    %c0_i32_0 = arith.constant 0 : i32
    %c0_i32_1 = arith.constant 0 : i32
    return %c0_i32, %c0_i32_0 : i32, i32
  }
  func.func @transform_4(%arg0: i32) -> (i32, i32) {
    %c0_i32 = arith.constant 0 : i32
    %c0_i32_0 = arith.constant 0 : i32
    %c0_i32_1 = arith.constant 0 : i32
    return %c0_i32, %c0_i32_0 : i32, i32
  }
  func.func @transform_5(%arg0: i32) -> (i32, i32) {
    %c0_i32 = arith.constant 0 : i32
    %c0_i32_0 = arith.constant 0 : i32
    %c0_i32_1 = arith.constant 0 : i32
    return %c0_i32, %c0_i32_0 : i32, i32
  }
  func.func @transform_6(%arg0: i32) -> (i32, i32) {
    %c0_i32 = arith.constant 0 : i32
    %c0_i32_0 = arith.constant 0 : i32
    %c0_i32_1 = arith.constant 0 : i32
    return %c0_i32, %c0_i32_0 : i32, i32
  }
  func.func @transform_7(%arg0: i32) -> (i32, i32) {
    %c0_i32 = arith.constant 0 : i32
    %c0_i32_0 = arith.constant 0 : i32
    return %c0_i32, %arg0 : i32, i32
  }
}

</mosaic_0001>

<bundles_post_ra>
// kernel: tpu_custom_call.1
= control target key start
LH: loop header
LB: loop body
LE: loop exit
PB: predicated region body
PF: predicated region fallthrough
CT: control target
= control target key end

     0   :  { %s1407_s0 = inlined_call_operand.vmem [shape: f32[512,8], index: 0, kind: input, shape index: {}]   ;;  %s1408_s1 = inlined_call_operand.vmem [shape: f32[32,8], index: 1, kind: input, shape index: {}]   ;;  %s1409_s2 = inlined_call_operand.vmem [shape: f32[32,1], index: 2, kind: input, shape index: {}]   ;;  %s1410_s3 = inlined_call_operand.vmem [shape: f32[32,32], index: 3, kind: input, shape index: {}]   ;;  %s1411_s4 = inlined_call_operand.vmem [shape: f32[32,1], index: 4, kind: input, shape index: {}]   ;;  %s1412_s5 = inlined_call_operand.vmem [shape: f32[1,32], index: 5, kind: input, shape index: {}]   ;;  %s1413_s6 = inlined_call_operand.<no memory space> [shape: f32[1,1], index: 6, kind: input, shape index: {}]   ;;  %s1414_s7 = inlined_call_operand.hbm [shape: f32[1,512], index: 7, kind: output, shape index: {}]  }
   0x1   :  { %v12_v0 = vstv %s1413_s6 }
   0x2   :  { %13 = vst [vmem:[#allocation2] sm:$0x1] %v12_v0 }
   0x3   :  { %v44_v1 = vld [vmem:[%s1407_s0 + $0x78] sm:$0xff]  ;;  %vm121_vm0 = vcmask 64512   ;;  %v43_v5 = vld [vmem:[%s1407_s0 + $0x70] sm:$0xff]  ;;  %v42_v9 = vld [vmem:[%s1407_s0 + $0x68] sm:$0xff] }
   0x4   :  { %v60_v2 = vld [vmem:[%s1407_s0 + $0xf8] sm:$0xff]  ;;  %833 = vmatpush.xpose.msk.msra.mxu0 %vm121_vm0, %v44_v1  ;;  %v59_v6 = vld [vmem:[%s1407_s0 + $0xf0] sm:$0xff]  ;;  %v58_v10 = vld [vmem:[%s1407_s0 + $0xe8] sm:$0xff] }
   0x5   :  { %v76_v3 = vld [vmem:[%s1407_s0 + $0x178] sm:$0xff]  ;;  %853 = vmatpush.xpose.msk.msra.mxu1 %vm121_vm0, %v60_v2  ;;  %v75_v7 = vld [vmem:[%s1407_s0 + $0x170] sm:$0xff]  ;;  %v74_v11 = vld [vmem:[%s1407_s0 + $0x168] sm:$0xff] }
   0x6   :  { %v92_v4 = vld [vmem:[%s1407_s0 + $0x1f8] sm:$0xff]  ;;  %873 = vmatpush.xpose.msk.msra.mxu2 %vm121_vm0, %v76_v3  ;;  %v91_v8 = vld [vmem:[%s1407_s0 + $0x1f0] sm:$0xff]  ;;  %v90_v12 = vld [vmem:[%s1407_s0 + $0x1e8] sm:$0xff] }
   0x7   :  { %893 = vmatpush.xpose.msk.msra.mxu3 %vm121_vm0, %v92_v4  ;;  %v41_v13 = vld [vmem:[%s1407_s0 + $0x60] sm:$0xff]  ;;  %v40_v17 = vld [vmem:[%s1407_s0 + $0x58] sm:$0xff] }
   0x8   :  { %834 = vmatpush.xpose.msk.msra.mxu0 %vm121_vm0, %v43_v5  ;;  %v57_v14 = vld [vmem:[%s1407_s0 + $0xe0] sm:$0xff]  ;;  %v56_v18 = vld [vmem:[%s1407_s0 + $0xd8] sm:$0xff] }
   0x9   :  { %854 = vmatpush.xpose.msk.msra.mxu1 %vm121_vm0, %v59_v6  ;;  %v73_v15 = vld [vmem:[%s1407_s0 + $0x160] sm:$0xff]  ;;  %v72_v19 = vld [vmem:[%s1407_s0 + $0x158] sm:$0xff] }
   0xa   :  { %874 = vmatpush.xpose.msk.msra.mxu2 %vm121_vm0, %v75_v7  ;;  %v89_v16 = vld [vmem:[%s1407_s0 + $0x1e0] sm:$0xff]  ;;  %v88_v20 = vld [vmem:[%s1407_s0 + $0x1d8] sm:$0xff] }
   0xb   :  { %894 = vmatpush.xpose.msk.msra.mxu3 %vm121_vm0, %v91_v8 }
   0xc   :  { %835 = vmatpush.xpose.msk.msra.mxu0 %vm121_vm0, %v42_v9 }
   0xd   :  { %855 = vmatpush.xpose.msk.msra.mxu1 %vm121_vm0, %v58_v10 }
   0xe   :  { %875 = vmatpush.xpose.msk.msra.mxu2 %vm121_vm0, %v74_v11 }
   0xf   :  { %895 = vmatpush.xpose.msk.msra.mxu3 %vm121_vm0, %v90_v12 }
  0x10   :  { %836 = vmatpush.xpose.msk.msra.mxu0 %vm121_vm0, %v41_v13 }
  0x11   :  { %856 = vmatpush.xpose.msk.msra.mxu1 %vm121_vm0, %v57_v14 }
  0x12   :  { %876 = vmatpush.xpose.msk.msra.mxu2 %vm121_vm0, %v73_v15 }
  0x13   :  { %896 = vmatpush.xpose.msk.msra.mxu3 %vm121_vm0, %v89_v16 }
  0x14   :  { %14 = vsyncpa [#allocation4], 0  ;;  %837 = vmatpush.xpose.msk.msra.mxu0 %vm121_vm0, %v40_v17  ;;  %v39_v21 = vld [vmem:[%s1407_s0 + $0x50] sm:$0xff]  ;;  %v38_v25 = vld [vmem:[%s1407_s0 + $0x48] sm:$0xff]  ;;  %v984_v41 = vmov 0   ;;  %vm486_vm1 = vcmask 261120  }
  0x15   :  { %857 = vmatpush.xpose.msk.msra.mxu1 %vm121_vm0, %v56_v18  ;;  %v55_v22 = vld [vmem:[%s1407_s0 + $0xd0] sm:$0xff]  ;;  %v54_v26 = vld [vmem:[%s1407_s0 + $0xc8] sm:$0xff]  ;;  %v37_v29 = vld [vmem:[%s1407_s0 + $0x40] sm:$0xff]  ;;  %940 = vset.pattern.permute.xlu1 %v984_v41  ;;  %vm805_vm7 = vcmask 1040384  }
  0x16   :  { %877 = vmatpush.xpose.msk.msra.mxu2 %vm121_vm0, %v72_v19  ;;  %v71_v23 = vld [vmem:[%s1407_s0 + $0x150] sm:$0xff]  ;;  %v70_v27 = vld [vmem:[%s1407_s0 + $0x148] sm:$0xff]  ;;  %v53_v30 = vld [vmem:[%s1407_s0 + $0xc0] sm:$0xff]  ;;  %939 = vset.pattern.permute.xlu0 %v984_v41 }
  0x17   :  { %897 = vmatpush.xpose.msk.msra.mxu3 %vm121_vm0, %v88_v20  ;;  %v87_v24 = vld [vmem:[%s1407_s0 + $0x1d0] sm:$0xff]  ;;  %v86_v28 = vld [vmem:[%s1407_s0 + $0x1c8] sm:$0xff]  ;;  %v69_v31 = vld [vmem:[%s1407_s0 + $0x140] sm:$0xff]  ;;  %941 = vset.pattern.permute.xlu2 %v984_v41 }
  0x18   :  { %838 = vmatpush.xpose.msk.msra.mxu0 %vm121_vm0, %v39_v21  ;;  %v85_v32 = vld [vmem:[%s1407_s0 + $0x1c0] sm:$0xff]  ;;  %v36_v33 = vld [vmem:[%s1407_s0 + $0x38] sm:$0xff]  ;;  %v35_v37 = vld [vmem:[%s1407_s0 + $0x30] sm:$0xff] }
  0x19   :  { %858 = vmatpush.xpose.msk.msra.mxu1 %vm121_vm0, %v55_v22  ;;  %v52_v34 = vld [vmem:[%s1407_s0 + $0xb8] sm:$0xff]  ;;  %v51_v38 = vld [vmem:[%s1407_s0 + $0xb0] sm:$0xff]  ;;  %v34_v42 = vld [vmem:[%s1407_s0 + $0x28] sm:$0xff] }
  0x1a   :  { %878 = vmatpush.xpose.msk.msra.mxu2 %vm121_vm0, %v71_v23  ;;  %v68_v35 = vld [vmem:[%s1407_s0 + $0x138] sm:$0xff]  ;;  %v67_v39 = vld [vmem:[%s1407_s0 + $0x130] sm:$0xff]  ;;  %v50_v43 = vld [vmem:[%s1407_s0 + $0xa8] sm:$0xff] }
  0x1b   :  { %898 = vmatpush.xpose.msk.msra.mxu3 %vm121_vm0, %v87_v24  ;;  %v84_v36 = vld [vmem:[%s1407_s0 + $0x1b8] sm:$0xff]  ;;  %v83_v40 = vld [vmem:[%s1407_s0 + $0x1b0] sm:$0xff]  ;;  %v66_v44 = vld [vmem:[%s1407_s0 + $0x128] sm:$0xff] }
  0x1c   :  { %839 = vmatpush.xpose.msk.msra.mxu0 %vm121_vm0, %v38_v25  ;;  %v82_v45 = vld [vmem:[%s1407_s0 + $0x1a8] sm:$0xff]  ;;  %v33_v47 = vld [vmem:[%s1407_s0 + $0x20] sm:$0xff]  ;;  %v32_v51 = vld [vmem:[%s1407_s0 + $0x18] sm:$0xff] }
  0x1d   :  { %859 = vmatpush.xpose.msk.msra.mxu1 %vm121_vm0, %v54_v26  ;;  %v98_v46 = vld [vmem:[%s1409_s2 + $0x8] sm:$0xff]  ;;  %v49_v48 = vld [vmem:[%s1407_s0 + $0xa0] sm:$0xff]  ;;  %v48_v52 = vld [vmem:[%s1407_s0 + $0x98] sm:$0xff] }
  0x1e   :  { %879 = vmatpush.xpose.msk.msra.mxu2 %vm121_vm0, %v70_v27  ;;  %v65_v49 = vld [vmem:[%s1407_s0 + $0x120] sm:$0xff]  ;;  %108 = vperm.xlu1 %940, %v98_v46   ;;  %v64_v53 = vld [vmem:[%s1407_s0 + $0x118] sm:$0xff]  ;;  %v31_v57 = vld [vmem:[%s1407_s0 + $0x10] sm:$0xff] }
  0x1f   :  { %899 = vmatpush.xpose.msk.msra.mxu3 %vm121_vm0, %v86_v28  ;;  %v81_v50 = vld [vmem:[%s1407_s0 + $0x1a0] sm:$0xff]  ;;  %v80_v54 = vld [vmem:[%s1407_s0 + $0x198] sm:$0xff]  ;;  %v47_v58 = vld [vmem:[%s1407_s0 + $0x90] sm:$0xff] }
  0x20   :  { %840 = vmatpush.xpose.msk.msra.mxu0 %vm121_vm0, %v37_v29  ;;  %v97_v55 = vld [vmem:[%s1409_s2] sm:$0xff]  ;;  %v100_v56 = vld [vmem:[%s1409_s2 + $0x18] sm:$0xff]  ;;  %v63_v59 = vld [vmem:[%s1407_s0 + $0x110] sm:$0xff] }
  0x21   :  { %860 = vmatpush.xpose.msk.msra.mxu1 %vm121_vm0, %v53_v30  ;;  %v79_v60 = vld [vmem:[%s1407_s0 + $0x190] sm:$0xff]  ;;  %118 = vperm.xlu0 %939, %v100_v56   ;;  %v30_v61 = vld [vmem:[%s1407_s0 + $0x8] sm:$0xff]  ;;  %v462_v2 = vld [vmem:[%s1411_s4] sm:$0xff] }
  0x22   :  { %880 = vmatpush.xpose.msk.msra.mxu2 %vm121_vm0, %v69_v31  ;;  %v46_v62 = vld [vmem:[%s1407_s0 + $0x88] sm:$0xff]  ;;  %v99_v1 = vld [vmem:[%s1409_s2 + $0x10] sm:$0xff]  ;;  %v29_v3 = vld [vmem:[%s1407_s0] sm:$0xff]  ;;  %s824_s2 = sshll.u32 %s1414_s7, 4  ;;  %s825_s2 = int_to_ptr.hbm [resolvable:$true] %s824_s2 }
  0x23   :  { %900 = vmatpush.xpose.msk.msra.mxu3 %vm121_vm0, %v85_v32  ;;  %v62_v63 = vld [vmem:[%s1407_s0 + $0x108] sm:$0xff]  ;;  %v45_v4 = vld [vmem:[%s1407_s0 + $0x80] sm:$0xff]  ;;  %v95_v10 = vld [vmem:[%s1408_s1 + $0x10] sm:$0xff] }
  0x24   :  { %841 = vmatpush.xpose.msk.msra.mxu0 %vm121_vm0, %v36_v33  ;;  %v78_v0 = vld [vmem:[%s1407_s0 + $0x188] sm:$0xff]  ;;  %v61_v5 = vld [vmem:[%s1407_s0 + $0x100] sm:$0xff]  ;;  %v96_v11 = vld [vmem:[%s1408_s1 + $0x18] sm:$0xff] }
  0x25   :  { %861 = vmatpush.xpose.msk.msra.mxu1 %vm121_vm0, %v52_v34  ;;  %v77_v6 = vld [vmem:[%s1407_s0 + $0x180] sm:$0xff]  ;;  %v463_v8 = vld [vmem:[%s1411_s4 + $0x8] sm:$0xff] }
  0x26   :  { %881 = vmatpush.xpose.msk.msra.mxu2 %vm121_vm0, %v68_v35  ;;  %103 = vperm.xlu1 %940, %v97_v55   ;;  %v93_v7 = vld [vmem:[%s1408_s1] sm:$0xff]  ;;  %v94_v9 = vld [vmem:[%s1408_s1 + $0x8] sm:$0xff] }
  0x27   :  { %901 = vmatpush.xpose.msk.msra.mxu3 %vm121_vm0, %v84_v36  ;;  %v458_v56 = vld [vmem:[%s1410_s3] sm:$0xff] }
  0x28   :  { %842 = vmatpush.xpose.msk.msra.mxu0 %vm121_vm0, %v35_v37 }
  0x29   :  { %862 = vmatpush.xpose.msk.msra.mxu1 %vm121_vm0, %v51_v38  ;;  %113 = vperm.xlu0 %939, %v99_v1  }
  0x2a   :  { %882 = vmatpush.xpose.msk.msra.mxu2 %vm121_vm0, %v67_v39 }
  0x2b   :  { %902 = vmatpush.xpose.msk.msra.mxu3 %vm121_vm0, %v83_v40 }
  0x2c   :  { %843 = vmatpush.xpose.msk.msra.mxu0 %vm121_vm0, %v34_v42 }
  0x2d   :  { %863 = vmatpush.xpose.msk.msra.mxu1 %vm121_vm0, %v50_v43 }
  0x2e   :  { %883 = vmatpush.xpose.msk.msra.mxu2 %vm121_vm0, %v66_v44  ;;  %468 = vperm.xlu1 %940, %v462_v2   ;;  %v459_v2 = vld [vmem:[%s1410_s3 + $0x8] sm:$0xff] }
  0x2f   :  { %903 = vmatpush.xpose.msk.msra.mxu3 %vm121_vm0, %v82_v45 }
  0x30   :  { %844 = vmatpush.xpose.msk.msra.mxu0 %vm121_vm0, %v33_v47 }
  0x31   :  { %864 = vmatpush.xpose.msk.msra.mxu1 %vm121_vm0, %v49_v48  ;;  %473 = vperm.xlu0 %939, %v463_v8  }
  0x32   :  { %884 = vmatpush.xpose.msk.msra.mxu2 %vm121_vm0, %v65_v49 }
  0x33   :  { %904 = vmatpush.xpose.msk.msra.mxu3 %vm121_vm0, %v81_v50 }
  0x34   :  { %845 = vmatpush.xpose.msk.msra.mxu0 %vm121_vm0, %v32_v51 }
  0x35   :  { %865 = vmatpush.xpose.msk.msra.mxu1 %vm121_vm0, %v48_v52 }
  0x36   :  { %885 = vmatpush.xpose.msk.msra.mxu2 %vm121_vm0, %v64_v53 }
  0x37   :  { %905 = vmatpush.xpose.msk.msra.mxu3 %vm121_vm0, %v80_v54 }
  0x38   :  { %846 = vmatpush.xpose.msk.msra.mxu0 %vm121_vm0, %v31_v57 }
  0x39   :  { %866 = vmatpush.xpose.msk.msra.mxu1 %vm121_vm0, %v47_v58 }
  0x3a   :  { %886 = vmatpush.xpose.msk.msra.mxu2 %vm121_vm0, %v63_v59 }
  0x3b   :  { %906 = vmatpush.xpose.msk.msra.mxu3 %vm121_vm0, %v79_v60 }
  0x3c   :  { %847 = vmatpush.xpose.msk.msra.mxu0 %vm121_vm0, %v30_v61  ;;  %v465_v61 = vld [vmem:[%s1411_s4 + $0x18] sm:$0xff] }
  0x3d   :  { %867 = vmatpush.xpose.msk.msra.mxu1 %vm121_vm0, %v46_v62  ;;  %483 = vperm.xlu2 %941, %v465_v61  }
  0x3e   :  { %887 = vmatpush.xpose.msk.msra.mxu2 %vm121_vm0, %v62_v63 }
  0x3f   :  { %907 = vmatpush.xpose.msk.msra.mxu3 %vm121_vm0, %v78_v0 }
  0x40   :  { %848 = vmatpush.xpose.msk.msra.mxu0 %vm121_vm0, %v29_v3  ;;  %v464_v3 = vld [vmem:[%s1411_s4 + $0x10] sm:$0xff] }
  0x41   :  { %868 = vmatpush.xpose.msk.msra.mxu1 %vm121_vm0, %v45_v4  ;;  %v460_v4 = vld [vmem:[%s1410_s3 + $0x10] sm:$0xff] }
  0x42   :  { %888 = vmatpush.xpose.msk.msra.mxu2 %vm121_vm0, %v61_v5  ;;  %v632_v5 = vld [vmem:[#allocation2] sm:$0x1] }
  0x43   :  { %908 = vmatpush.xpose.msk.msra.mxu3 %vm121_vm0, %v77_v6  ;;  %849 = vmatmul.msk.f32.vlgmr.msra.gmra.mxu0 %vm121_vm0, %v93_v7  ;;  %v461_v6 = vld [vmem:[%s1410_s3 + $0x18] sm:$0xff] }
  0x44   :  { %869 = vmatmul.msk.f32.vlgmr.msra.gmra.mxu1 %vm121_vm0, %v93_v7 }
  0x45   :  { %889 = vmatmul.msk.f32.vlgmr.msra.gmra.mxu2 %vm121_vm0, %v93_v7  ;;  %478 = vperm.xlu2 %941, %v464_v3  }
  0x46   :  { %909 = vmatmul.msk.f32.vlgmr.msra.gmra.mxu3 %vm121_vm0, %v93_v7 }
  0x4b   :  { %850 = vmatmul.msk.f32.gmra.mxu0 %vm121_vm0, %v94_v9 }
  0x4c   :  { %870 = vmatmul.msk.f32.gmra.mxu1 %vm121_vm0, %v94_v9 }
  0x4d   :  { %890 = vmatmul.msk.f32.gmra.mxu2 %vm121_vm0, %v94_v9  ;;  %635 = vperm.xlu2 %941, %v632_v5  }
  0x4e   :  { %910 = vmatmul.msk.f32.gmra.mxu3 %vm121_vm0, %v94_v9 }
  0x53   :  { %851 = vmatmul.msk.f32.gmra.mxu0 %vm121_vm0, %v95_v10 }
  0x54   :  { %871 = vmatmul.msk.f32.gmra.mxu1 %vm121_vm0, %v95_v10 }
  0x55   :  { %891 = vmatmul.msk.f32.gmra.mxu2 %vm121_vm0, %v95_v10 }
  0x56   :  { %911 = vmatmul.msk.f32.gmra.mxu3 %vm121_vm0, %v95_v10 }
  0x5b   :  { %852 = vmatmul.msk.f32.gmra.mxu0 %vm121_vm0, %v96_v11 }
  0x5c   :  { %872 = vmatmul.msk.f32.gmra.mxu1 %vm121_vm0, %v96_v11 }
  0x5d   :  { %892 = vmatmul.msk.f32.gmra.mxu2 %vm121_vm0, %v96_v11 }
  0x5e   :  { %912 = vmatmul.msk.f32.gmra.mxu3 %vm121_vm0, %v96_v11 }
  0x90   :  { %v109_v23 = vpop.permute.xlu1 %108 }
  0x93   :  { %v119_v18 = vpop.permute.xlu0 %118 }
  0x97   :  { %v484_v11 = vpop.permute.xlu2 %483 }
  0x98   :  { %v104_v34 = vpop.permute.xlu1 %103 }
  0x9b   :  { %v114_v24 = vpop.permute.xlu0 %113 }
  0xc0   :  { %v343_v12 = vpop.f32.mrf.mxu0 }
  0xc1   :  { %v372_v13 = vpop.f32.mrf.mxu1  ;;  %v344_v38 = vadd.f32 %v343_v12, %v104_v34 }
  0xc2   :  { %v373_v42 = vadd.f32 %v372_v13, %v104_v34 }
  0xc3   :  { %v442_v50 = vmax.f32 %v344_v38, 0.0 }
  0xc4   :  { %v443_v51 = vmax.f32 %v373_v42, 0.0 }
  0xc8   :  { %v401_v14 = vpop.f32.mrf.mxu2  ;;  %v346_v16 = vpop.f32.mrf.mxu0 }
  0xc9   :  { %v430_v15 = vpop.f32.mrf.mxu3  ;;  %v375_v17 = vpop.f32.mrf.mxu1  ;;  %v347_v27 = vadd.f32 %v346_v16, %v109_v23  ;;  %v402_v57 = vadd.f32 %v401_v14, %v104_v34 }
  0xca   :  { %v376_v35 = vadd.f32 %v375_v17, %v109_v23  ;;  %v431_v58 = vadd.f32 %v430_v15, %v104_v34 }
  0xcb   :  { %v446_v39 = vmax.f32 %v347_v27, 0.0  ;;  %v444_v0 = vmax.f32 %v402_v57, 0.0 }
  0xcc   :  { %v447_v43 = vmax.f32 %v376_v35, 0.0  ;;  %v445_v1 = vmax.f32 %v431_v58, 0.0 }
  0xd0   :  { %v404_v19 = vpop.f32.mrf.mxu2  ;;  %v349_v21 = vpop.f32.mrf.mxu0 }
  0xd1   :  { %v433_v20 = vpop.f32.mrf.mxu3  ;;  %v378_v22 = vpop.f32.mrf.mxu1  ;;  %v350_v30 = vadd.f32 %v349_v21, %v114_v24  ;;  %v405_v52 = vadd.f32 %v404_v19, %v109_v23 }
  0xd2   :  { %v379_v31 = vadd.f32 %v378_v22, %v114_v24  ;;  %v434_v53 = vadd.f32 %v433_v20, %v109_v23  ;;  %v474_v23 = vpop.permute.xlu0 %473 }
  0xd3   :  { %v450_v40 = vmax.f32 %v350_v30, 0.0  ;;  %v448_v62 = vmax.f32 %v405_v52, 0.0 }
  0xd4   :  { %v451_v41 = vmax.f32 %v379_v31, 0.0  ;;  %v449_v63 = vmax.f32 %v434_v53, 0.0 }
  0xd8   :  { %v407_v25 = vpop.f32.mrf.mxu2  ;;  %v352_v28 = vpop.f32.mrf.mxu0 }
  0xd9   :  { %v436_v26 = vpop.f32.mrf.mxu3  ;;  %v381_v29 = vpop.f32.mrf.mxu1  ;;  %v353_v32 = vadd.f32 %v352_v28, %v119_v18  ;;  %v408_v46 = vadd.f32 %v407_v25, %v114_v24 }
  0xda   :  { %v382_v33 = vadd.f32 %v381_v29, %v119_v18  ;;  %v437_v47 = vadd.f32 %v436_v26, %v114_v24  ;;  %v469_v28 = vpop.permute.xlu1 %468 }
  0xdb   :  { %v454_v36 = vmax.f32 %v353_v32, 0.0  ;;  %v452_v59 = vmax.f32 %v408_v46, 0.0 }
  0xdc   :  { %v455_v37 = vmax.f32 %v382_v33, 0.0  ;;  %v453_v60 = vmax.f32 %v437_v47, 0.0 }
  0xdd   :  { %511 = vmatpush.msrb.mxu0 %v454_v36 }
  0xde   :  { %540 = vmatpush.msrb.mxu1 %v455_v37 }
  0xdf   :  { %512 = vmatpush.msrb.mxu0 %v450_v40 }
  0xe0   :  { %v410_v44 = vpop.f32.mrf.mxu2  ;;  %541 = vmatpush.msrb.mxu1 %v451_v41  ;;  %v631_v41 = vld [vmem:[%s1412_s5] sm:$0x1]  ;;  %s985_s5 = smov [#allocation3]  }
  0xe1   :  { %v439_v45 = vpop.f32.mrf.mxu3  ;;  %v411_v48 = vadd.f32 %v410_v44, %v119_v18  ;;  %513 = vmatpush.msrb.mxu0 %v446_v39  ;;  %s822_s15 = sshll.u32 %s985_s5, 4  ;;  %s823_s15 = int_to_ptr.vmem [resolvable:$true] %s822_s15 }
  0xe2   :  { %v440_v49 = vadd.f32 %v439_v45, %v119_v18  ;;  %542 = vmatpush.msrb.mxu1 %v447_v43  ;;  %v479_v18 = vpop.permute.xlu2 %478 }
  0xe3   :  { %v456_v54 = vmax.f32 %v411_v48, 0.0  ;;  %514 = vmatpush.msrb.mxu0 %v442_v50 }
  0xe4   :  { %v457_v55 = vmax.f32 %v440_v49, 0.0  ;;  %543 = vmatpush.msrb.mxu1 %v443_v51  ;;  %913 = vmatmul.msk.f32.vlgmr.msrb.gmra.mxu0 %vm486_vm1, %v458_v56 }
  0xe5   :  { %569 = vmatpush.msrb.mxu2 %v456_v54  ;;  %917 = vmatmul.msk.f32.vlgmr.msrb.gmra.mxu1 %vm486_vm1, %v458_v56 }
  0xe6   :  { %598 = vmatpush.msrb.mxu3 %v457_v55 }
  0xe7   :  { %570 = vmatpush.msrb.mxu2 %v452_v59 }
  0xe8   :  { %599 = vmatpush.msrb.mxu3 %v453_v60 }
  0xe9   :  { %571 = vmatpush.msrb.mxu2 %v448_v62 }
  0xea   :  { %600 = vmatpush.msrb.mxu3 %v449_v63  ;;  %v636_v60 = vpop.permute.xlu2 %635 }
  0xeb   :  { %572 = vmatpush.msrb.mxu2 %v444_v0  ;;  %v638_v61 = vperm.slane %v636_v60, 0 }
  0xec   :  { %601 = vmatpush.msrb.mxu3 %v445_v1  ;;  %921 = vmatmul.msk.f32.vlgmr.msrb.gmra.mxu2 %vm486_vm1, %v458_v56 }
  0xed   :  { %925 = vmatmul.msk.f32.vlgmr.msrb.gmra.mxu3 %vm486_vm1, %v458_v56  ;;  %914 = vmatmul.msk.f32.gmra.mxu0 %vm486_vm1, %v459_v2 }
  0xee   :  { %918 = vmatmul.msk.f32.gmra.mxu1 %vm486_vm1, %v459_v2 }
  0xf4   :  { %922 = vmatmul.msk.f32.gmra.mxu2 %vm486_vm1, %v459_v2 }
  0xf5   :  { %926 = vmatmul.msk.f32.gmra.mxu3 %vm486_vm1, %v459_v2  ;;  %915 = vmatmul.msk.f32.gmra.mxu0 %vm486_vm1, %v460_v4 }
  0xf6   :  { %919 = vmatmul.msk.f32.gmra.mxu1 %vm486_vm1, %v460_v4 }
  0xfc   :  { %923 = vmatmul.msk.f32.gmra.mxu2 %vm486_vm1, %v460_v4 }
  0xfd   :  { %927 = vmatmul.msk.f32.gmra.mxu3 %vm486_vm1, %v460_v4  ;;  %916 = vmatmul.msk.f32.gmra.mxu0 %vm486_vm1, %v461_v6 }
  0xfe   :  { %920 = vmatmul.msk.f32.gmra.mxu1 %vm486_vm1, %v461_v6 }
 0x104   :  { %924 = vmatmul.msk.f32.gmra.mxu2 %vm486_vm1, %v461_v6 }
 0x105   :  { %928 = vmatmul.msk.f32.gmra.mxu3 %vm486_vm1, %v461_v6 }
 0x161   :  { %v516_v7 = vpop.f32.mrf.mxu0 }
 0x162   :  { %v545_v8 = vpop.f32.mrf.mxu1  ;;  %v517_v35 = vadd.f32 %v516_v7, %v469_v28 }
 0x163   :  { %v546_v36 = vadd.f32 %v545_v8, %v469_v28 }
 0x164   :  { %v615_v39 = vmax.f32 %v517_v35, 0.0 }
 0x165   :  { %v616_v40 = vmax.f32 %v546_v36, 0.0 }
 0x16a   :  { %v519_v9 = vpop.f32.mrf.mxu0 }
 0x16b   :  { %v548_v10 = vpop.f32.mrf.mxu1  ;;  %v520_v26 = vadd.f32 %v519_v9, %v474_v23 }
 0x16c   :  { %v549_v27 = vadd.f32 %v548_v10, %v474_v23 }
 0x16d   :  { %v619_v37 = vmax.f32 %v520_v26, 0.0 }
 0x16e   :  { %v620_v38 = vmax.f32 %v549_v27, 0.0 }
 0x16f   :  { %v574_v12 = vpop.f32.mrf.mxu2 }
 0x170   :  { %v603_v13 = vpop.f32.mrf.mxu3  ;;  %v575_v52 = vadd.f32 %v574_v12, %v469_v28 }
 0x171   :  { %v604_v53 = vadd.f32 %v603_v13, %v469_v28 }
 0x172   :  { %v522_v14 = vpop.f32.mrf.mxu0  ;;  %v617_v58 = vmax.f32 %v575_v52, 0.0  ;;  %v812_v52 = vlaneseq }
 0x173   :  { %v551_v15 = vpop.f32.mrf.mxu1  ;;  %v523_v19 = vadd.f32 %v522_v14, %v479_v18  ;;  %v618_v59 = vmax.f32 %v604_v53, 0.0 }
 0x174   :  { %v552_v20 = vadd.f32 %v551_v15, %v479_v18 }
 0x175   :  { %v623_v31 = vmax.f32 %v523_v19, 0.0 }
 0x176   :  { %v624_v32 = vmax.f32 %v552_v20, 0.0 }
 0x177   :  { %v577_v16 = vpop.f32.mrf.mxu2 }
 0x178   :  { %v606_v17 = vpop.f32.mrf.mxu3  ;;  %v578_v48 = vadd.f32 %v577_v16, %v474_v23 }
 0x179   :  { %v607_v49 = vadd.f32 %v606_v17, %v474_v23 }
 0x17a   :  { %v525_v21 = vpop.f32.mrf.mxu0  ;;  %v621_v56 = vmax.f32 %v578_v48, 0.0 }
 0x17b   :  { %v554_v22 = vpop.f32.mrf.mxu1  ;;  %v526_v24 = vadd.f32 %v525_v21, %v484_v11  ;;  %v622_v57 = vmax.f32 %v607_v49, 0.0 }
 0x17c   :  { %v555_v25 = vadd.f32 %v554_v22, %v484_v11 }
 0x17d   :  { %v627_v29 = vmax.f32 %v526_v24, 0.0 }
 0x17e   :  { %v628_v30 = vmax.f32 %v555_v25, 0.0 }
 0x17f   :  { %v580_v33 = vpop.f32.mrf.mxu2  ;;  %654 = vmatpush.msra.mxu0 %v627_v29 }
 0x180   :  { %v609_v34 = vpop.f32.mrf.mxu3  ;;  %674 = vmatpush.msra.mxu1 %v628_v30  ;;  %v581_v44 = vadd.f32 %v580_v33, %v479_v18 }
 0x181   :  { %655 = vmatpush.msra.mxu0 %v623_v31  ;;  %v610_v45 = vadd.f32 %v609_v34, %v479_v18 }
 0x182   :  { %675 = vmatpush.msra.mxu1 %v624_v32  ;;  %v625_v54 = vmax.f32 %v581_v44, 0.0 }
 0x183   :  { %656 = vmatpush.msra.mxu0 %v619_v37  ;;  %v626_v55 = vmax.f32 %v610_v45, 0.0 }
 0x184   :  { %676 = vmatpush.msra.mxu1 %v620_v38 }
 0x185   :  { %657 = vmatpush.msra.mxu0 %v615_v39 }
 0x186   :  { %677 = vmatpush.msra.mxu1 %v616_v40  ;;  %929 = vmatmul.msk.f32.vlgmr.msra.gmra.mxu0 %vm486_vm1, %v631_v41 }
 0x187   :  { %v583_v42 = vpop.f32.mrf.mxu2  ;;  %930 = vmatmul.msk.f32.vlgmr.msra.gmra.mxu1 %vm486_vm1, %v631_v41 }
 0x188   :  { %v612_v43 = vpop.f32.mrf.mxu3  ;;  %v584_v46 = vadd.f32 %v583_v42, %v484_v11 }
 0x189   :  { %v613_v47 = vadd.f32 %v612_v43, %v484_v11 }
 0x18a   :  { %v629_v50 = vmax.f32 %v584_v46, 0.0 }
 0x18b   :  { %v630_v51 = vmax.f32 %v613_v47, 0.0 }
 0x18c   :  { %694 = vmatpush.msra.mxu2 %v629_v50 }
 0x18d   :  { %714 = vmatpush.msra.mxu3 %v630_v51 }
 0x18e   :  { %695 = vmatpush.msra.mxu2 %v625_v54 }
 0x18f   :  { %715 = vmatpush.msra.mxu3 %v626_v55 }
 0x190   :  { %696 = vmatpush.msra.mxu2 %v621_v56 }
 0x191   :  { %716 = vmatpush.msra.mxu3 %v622_v57 }
 0x192   :  { %697 = vmatpush.msra.mxu2 %v617_v58 }
 0x193   :  { %717 = vmatpush.msra.mxu3 %v618_v59  ;;  %931 = vmatmul.msk.f32.vlgmr.msra.gmra.mxu2 %vm486_vm1, %v631_v41 }
 0x194   :  { %932 = vmatmul.msk.f32.vlgmr.msra.gmra.mxu3 %vm486_vm1, %v631_v41 }
 0x203   :  { %v659_v62 = vpop.f32.mrf.mxu0 }
 0x204   :  { %v679_v63 = vpop.f32.mrf.mxu1  ;;  %v660_v0 = vadd.f32 %v659_v62, %v638_v61 }
 0x205   :  { %v680_v1 = vadd.f32 %v679_v63, %v638_v61 }
 0x206   :  { %v933_v3 = vmul.f32 -1.442695, %v660_v0 }
 0x207   :  { %v934_v2 = vmul.f32 -1.442695, %v680_v1 }
 0x209   :  { %942 = vpow2.f32 %v934_v2 }
 0x20a   :  { %944 = vpow2.f32 %v933_v3 }
 0x20f   :  { %v943_v4 = vpop.eup %942 }
 0x210   :  { %v735_v5 = vadd.f32 1.0, %v943_v4  ;;  %v945_v6 = vpop.eup %944 }
 0x211   :  { %v1372_v7 = vadd.f32 1.0, %v945_v6 }
 0x212   :  { %946 = vrcp.f32 %v735_v5  ;;  %v764_v25 = vand.u32 2147483648, %v735_v5  ;;  %vm758_vm3 = vweird.f32 %v735_v5  ;;  %v762_v32 = vand.u32 2147483647, %v735_v5 }
 0x213   :  { %948 = vrcp.f32 %v1372_v7  ;;  %vm743_vm4 = vweird.f32 %v1372_v7  ;;  %v747_v34 = vand.u32 2147483647, %v1372_v7  ;;  %v749_v47 = vand.u32 2147483648, %v1372_v7 }
 0x214   :  { %v765_v36 = vor.u32 1.1754944e-38, %v764_v25  ;;  %vm763_vm9 = vcmp.eq.f32.partialorder %v762_v32, 8.507059e+37 }
 0x215   :  { %v750_v59 = vor.u32 1.1754944e-38, %v749_v47 }
 0x216   :  { %v699_v8 = vpop.f32.mrf.mxu2 }
 0x217   :  { %v719_v9 = vpop.f32.mrf.mxu3  ;;  %v700_v10 = vadd.f32 %v699_v8, %v638_v61 }
 0x218   :  { %v720_v11 = vadd.f32 %v719_v9, %v638_v61  ;;  %v947_v14 = vpop.eup %946 }
 0x219   :  { %v935_v12 = vmul.f32 -1.442695, %v700_v10  ;;  %v754_v15 = vmul.f32 %v947_v14, %v735_v5  ;;  %v1375_v16 = vpop.eup %948  ;;  %vm759_vm2 = vweird.f32 %v947_v14 }
 0x21a   :  { %v936_v13 = vmul.f32 -1.442695, %v720_v11  ;;  %v739_v19 = vmul.f32 %v1375_v16, %v1372_v7  ;;  %vm744_vm5 = vweird.f32 %v1375_v16  ;;  %vm1383_vm6 = vmor %vm758_vm3, %vm759_vm2  ;;  %vm807_vm2 = vcmask 1042434  }
 0x21b   :  { %950 = vpow2.f32 %v935_v12  ;;  %v755_v20 = vsub.f32 1.0, %v754_v15  ;;  %vm1394_vm12 = vmor %vm743_vm4, %vm744_vm5  ;;  %vm748_vm3 = vcmp.eq.f32.partialorder %v747_v34, 8.507059e+37  ;;  %vm809_vm4 = vcmask 1041408  }
 0x21c   :  { %952 = vpow2.f32 %v936_v13  ;;  %v740_v23 = vsub.f32 1.0, %v739_v19  ;;  %vm814_vm5 = vcmp.lt.s32.totalorder %v812_v52, 512 }
 0x21d   :  { %v756_v24 = vmul.f32 %v947_v14, %v755_v20 }
 0x21e   :  { %v741_v27 = vmul.f32 %v1375_v16, %v740_v23 }
 0x21f   :  { %v757_v28 = vadd.f32 %v947_v14, %v756_v24 }
 0x220   :  { %v742_v39 = vadd.f32 %v1375_v16, %v741_v27 }
 0x221   :  { %v951_v17 = vpop.eup %950  ;;  %v761_v40 = vsel %vm1383_vm6, %v947_v14, %v757_v28 }
 0x222   :  { %v953_v18 = vpop.eup %952  ;;  %v736_v21 = vadd.f32 1.0, %v951_v17  ;;  %v766_v48 = vsel %vm763_vm9, %v765_v36, %v761_v40  ;;  %v746_v53 = vsel %vm1394_vm12, %v1375_v16, %v742_v39 }
 0x223   :  { %v737_v22 = vadd.f32 1.0, %v953_v18  ;;  %v802_v58 = vrot.slane %v766_v48, 7  ;;  %v751_v63 = vsel %vm748_vm3, %v750_v59, %v746_v53 }
 0x224   :  { %954 = vrcp.f32 %v736_v21  ;;  %v779_v37 = vand.u32 2147483648, %v736_v21  ;;  %v777_v43 = vand.u32 2147483647, %v736_v21  ;;  %vm773_vm11 = vweird.f32 %v736_v21 }
 0x225   :  { %956 = vrcp.f32 %v737_v22  ;;  %v794_v42 = vand.u32 2147483648, %v737_v22  ;;  %v792_v45 = vand.u32 2147483647, %v737_v22  ;;  %vm788_vm13 = vweird.f32 %v737_v22 }
 0x226   :  { %v780_v50 = vor.u32 1.1754944e-38, %v779_v37  ;;  %vm778_vm15 = vcmp.eq.f32.partialorder %v777_v43, 8.507059e+37  ;;  %v806_v0 = vsel %vm805_vm7, %v751_v63, %v802_v58 }
 0x227   :  { %v795_v55 = vor.u32 1.1754944e-38, %v794_v42  ;;  %vm793_vm1 = vcmp.eq.f32.partialorder %v792_v45, 8.507059e+37 }
 0x22a   :  { %v955_v26 = vpop.eup %954 }
 0x22b   :  { %v957_v29 = vpop.eup %956  ;;  %v769_v30 = vmul.f32 %v955_v26, %v736_v21  ;;  %vm774_vm8 = vweird.f32 %v955_v26 }
 0x22c   :  { %v784_v31 = vmul.f32 %v957_v29, %v737_v22  ;;  %vm789_vm10 = vweird.f32 %v957_v29  ;;  %vm775_vm14 = vmor %vm773_vm11, %vm774_vm8 }
 0x22d   :  { %v770_v33 = vsub.f32 1.0, %v769_v30  ;;  %vm790_vm0 = vmor %vm788_vm13, %vm789_vm10 }
 0x22e   :  { %v785_v38 = vsub.f32 1.0, %v784_v31 }
 0x22f   :  { %v771_v41 = vmul.f32 %v955_v26, %v770_v33 }
 0x230   :  { %v786_v44 = vmul.f32 %v957_v29, %v785_v38 }
 0x231   :  { %v772_v49 = vadd.f32 %v955_v26, %v771_v41 }
 0x232   :  { %v787_v51 = vadd.f32 %v957_v29, %v786_v44 }
 0x233   :  { %v776_v54 = vsel %vm775_vm14, %v955_v26, %v772_v49 }
 0x234   :  { %v781_v56 = vsel %vm778_vm15, %v780_v50, %v776_v54  ;;  %v791_v57 = vsel %vm790_vm0, %v957_v29, %v787_v51 }
 0x235   :  { %v796_v60 = vsel %vm793_vm1, %v795_v55, %v791_v57  ;;  %v803_v61 = vrot.slane %v781_v56, 6 }
 0x236   :  { %v804_v62 = vrot.slane %v796_v60, 5 }
 0x238   :  { %v808_v1 = vsel %vm807_vm2, %v803_v61, %v804_v62 }
 0x239   :  { %v810_v2 = vsel %vm809_vm4, %v806_v0, %v808_v1 }
 0x23a   :  { %816 = vst.msk [vmem:[#allocation3] sm:$0xf] %vm814_vm5, %v810_v2 }
 0x23b   :  { %827 = dma.vmem_to_hbm [thread:$0]  %s823_s15, 64, %s825_s2, [#allocation4]  }
 0x23c   :  { %982 = dma.done.wait [#allocation4], 64  }
 0x23d   :  { %983 = vsyncadd [#allocation4], 4294967232 }
 0x23e   :  { %832 = vsyncpa [#allocation4], 1 }

</bundles_post_ra>
